<compile_context>
chip_gen: v6e
topology: v6e:2x2x1
jax: 0.10.0
libtpu: 0.0.40
codegen_flags: <defaults>
</compile_context>

<pallas_src>
import jax
import jax.numpy as jnp
import numpy as np
from jax.experimental import pallas as pl
from jax.experimental.pallas import tpu as pltpu


def _round_up(n, m):
    return ((n + m - 1) // m) * m


def _generator_kernel(x_ref, w1_ref, b1_ref, w2_ref, b2_ref, w3_ref, b3_ref,
                      o_ref):
    # fc1: Linear + ReLU   (K=16 underfills MXU lanes, but this layer is ~3%
    # of total FLOPs — not worth repacking.)
    x = x_ref[...].astype(jnp.bfloat16)
    h1 = jnp.dot(x, w1_ref[...],
                 preferred_element_type=jnp.float32) + b1_ref[...]
    h1 = jnp.maximum(h1, 0.0).astype(jnp.bfloat16)
    # fc2: Linear + ReLU
    h2 = jnp.dot(h1, w2_ref[...],
                 preferred_element_type=jnp.float32) + b2_ref[...]
    h2 = jnp.maximum(h2, 0.0).astype(jnp.bfloat16)
    # fc3: Linear + Tanh (tanh on EUP, f32)
    h3 = jnp.dot(h2, w3_ref[...],
                 preferred_element_type=jnp.float32) + b3_ref[...]
    o_ref[...] = jnp.tanh(h3).astype(o_ref.dtype)


def generator_forward(x, params, input_dim, tile_m=512):
    """x: (B, input_dim) float32. Returns (B, 1, input_dim, input_dim)."""
    w1, b1, w2, b2, w3, b3 = params
    batch = x.shape[0]
    in_dim = x.shape[1]
    out_dim = w3.shape[1]

    # bf16 weights (f32 accumulation happens on the MXU); biases stay f32 and
    # are added to the f32 accumulator.
    w1 = w1.astype(jnp.bfloat16)
    w2 = w2.astype(jnp.bfloat16)
    w3 = w3.astype(jnp.bfloat16)

    # Batch tile: a multiple of 8 (f32 sublane). Cap at tile_m; for tiny demo
    # batches shrink to a single tile.
    tm = min(tile_m, _round_up(batch, 8))
    b_pad = _round_up(batch, tm)
    if b_pad != batch:
        x = jnp.pad(x, ((0, b_pad - batch), (0, 0)))

    grid = (b_pad // tm,)

    y = pl.pallas_call(
        _generator_kernel,
        out_shape=jax.ShapeDtypeStruct((b_pad, out_dim), jnp.float32),
        grid=grid,
        in_specs=[
            # activations: tiled over the batch axis
            pl.BlockSpec((tm, in_dim), lambda i: (i, 0)),
            # weights / biases: constant index_map -> VMEM-resident across steps
            pl.BlockSpec(w1.shape, lambda i: (0, 0)),
            pl.BlockSpec(b1.shape, lambda i: (0, 0)),
            pl.BlockSpec(w2.shape, lambda i: (0, 0)),
            pl.BlockSpec(b2.shape, lambda i: (0, 0)),
            pl.BlockSpec(w3.shape, lambda i: (0, 0)),
            pl.BlockSpec(b3.shape, lambda i: (0, 0)),
        ],
        out_specs=pl.BlockSpec((tm, out_dim), lambda i: (i, 0)),
        compiler_params=pltpu.CompilerParams(
            dimension_semantics=("parallel",),   # v7x: shard batch over 2 TCs
            vmem_limit_bytes=64 << 20,
        ),
    )(x, w1, b1, w2, b2, w3, b3)

    y = y[:batch]
    # PyTorch: x.view(-1, 1, input_dim, input_dim)  (requires out_dim == input_dim**2)
    return y.reshape(-1, 1, input_dim, input_dim)


def init_params(key, input_dim, output_dim):
    """Deterministic init mimicking PyTorch nn.Linear default (uniform ±1/sqrt(fan_in))."""
    dims = [(input_dim, 256), (256, 512), (512, output_dim)]
    params = []
    for fan_in, fan_out in dims:
        kw, kb, key = jax.random.split(key, 3)
        bound = 1.0 / np.sqrt(fan_in)
        w = jax.random.uniform(kw, (fan_in, fan_out), jnp.float32, -bound, bound)
        b = jax.random.uniform(kb, (1, fan_out), jnp.float32, -bound, bound)
        params.extend([w, b])
    return tuple(params)


def reference_forward(x, params, input_dim):
    """Pure-JAX reference with matching bf16 weights / activations, f32 accumulation."""
    w1, b1, w2, b2, w3, b3 = params
    bf = jnp.bfloat16
    h1 = jnp.maximum(
        jnp.dot(x.astype(bf), w1.astype(bf),
                preferred_element_type=jnp.float32) + b1, 0.0)
    h2 = jnp.maximum(
        jnp.dot(h1.astype(bf), w2.astype(bf),
                preferred_element_type=jnp.float32) + b2, 0.0)
    y = jnp.tanh(
        jnp.dot(h2.astype(bf), w3.astype(bf),
                preferred_element_type=jnp.float32) + b3)
    return y.reshape(-1, 1, input_dim, input_dim)


if __name__ == "__main__":
    input_dim = 16
    output_dim = input_dim * input_dim  # required for the final .view()

    key = jax.random.PRNGKey(0)
    k_x, k_x2, k_p = jax.random.split(key, 3)
    params = init_params(k_p, input_dim, output_dim)

    # Demo-sized batch (single small tile).
    batch = 2
    x = jax.random.normal(k_x, (batch, input_dim), jnp.float32)
    out = jax.block_until_ready(generator_forward(x, params, input_dim))
    ref = reference_forward(x, params, input_dim)
    assert out.shape == (batch, 1, input_dim, input_dim), out.shape
    np.testing.assert_allclose(np.asarray(out), np.asarray(ref),
                               rtol=1e-2, atol=1e-2)

    # Larger batch: exercises the multi-step batch grid + padding path.
    batch2 = 1000
    x2 = jax.random.normal(k_x2, (batch2, input_dim), jnp.float32)
    out2 = jax.block_until_ready(generator_forward(x2, params, input_dim))
    ref2 = reference_forward(x2, params, input_dim)
    assert out2.shape == (batch2, 1, input_dim, input_dim), out2.shape
    np.testing.assert_allclose(np.asarray(out2), np.asarray(ref2),
                               rtol=1e-2, atol=1e-2)

    print("KERNEL_OK")
</pallas_src>

<mosaic_0001>
module attributes {stable_mosaic.version = 11 : i64} {
  func.func @_generator_kernel(%arg0: i32, %arg1: memref<8x16xf32, #tpu.memory_space<vmem>>, %arg2: memref<16x256xbf16, #tpu.memory_space<vmem>>, %arg3: memref<1x256xf32, #tpu.memory_space<vmem>>, %arg4: memref<256x512xbf16, #tpu.memory_space<vmem>>, %arg5: memref<1x512xf32, #tpu.memory_space<vmem>>, %arg6: memref<512x256xbf16, #tpu.memory_space<vmem>>, %arg7: memref<1x256xf32, #tpu.memory_space<vmem>>, %arg8: memref<8x256xf32, #tpu.memory_space<vmem>>) attributes {dimension_semantics = [#tpu.dimension_semantics<parallel>], iteration_bounds = array<i64: 1>, scalar_prefetch = 0 : i64, scratch_operands = 0 : i64, tpu.core_type = #tpu.core_type<tc>, window_params = [{transform_indices = @transform_0, window_bounds = array<i64: 8, 16>}, {pipeline_mode = #tpu.pipeline_mode<synchronous>, transform_indices = @transform_1, window_bounds = array<i64: 16, 256>}, {pipeline_mode = #tpu.pipeline_mode<synchronous>, transform_indices = @transform_2, window_bounds = array<i64: 1, 256>}, {pipeline_mode = #tpu.pipeline_mode<synchronous>, transform_indices = @transform_3, window_bounds = array<i64: 256, 512>}, {pipeline_mode = #tpu.pipeline_mode<synchronous>, transform_indices = @transform_4, window_bounds = array<i64: 1, 512>}, {pipeline_mode = #tpu.pipeline_mode<synchronous>, transform_indices = @transform_5, window_bounds = array<i64: 512, 256>}, {pipeline_mode = #tpu.pipeline_mode<synchronous>, transform_indices = @transform_6, window_bounds = array<i64: 1, 256>}, {transform_indices = @transform_7, window_bounds = array<i64: 8, 256>}]} {
    %c0 = arith.constant 0 : index
    %c0_0 = arith.constant 0 : index
    %0 = vector.load %arg1[%c0, %c0_0] : memref<8x16xf32, #tpu.memory_space<vmem>>, vector<8x16xf32>
    %1 = arith.truncf %0 : vector<8x16xf32> to vector<8x16xbf16>
    %c0_1 = arith.constant 0 : index
    %c0_2 = arith.constant 0 : index
    %2 = vector.load %arg2[%c0_1, %c0_2] : memref<16x256xbf16, #tpu.memory_space<vmem>>, vector<16x256xbf16>
    %cst = arith.constant dense<0.000000e+00> : vector<8x256xf32>
    %3 = tpu.matmul %1, %2, %cst {dimension_numbers = #tpu.dot_dimension_numbers<[1], [0], [0], [1], [0, 0, 1, 1], [], []>} : vector<8x16xbf16>, vector<16x256xbf16>, vector<8x256xf32> -> vector<8x256xf32>
    %c0_3 = arith.constant 0 : index
    %c0_4 = arith.constant 0 : index
    %4 = vector.load %arg3[%c0_3, %c0_4] : memref<1x256xf32, #tpu.memory_space<vmem>>, vector<1x256xf32>
    %5 = vector.broadcast %4 : vector<1x256xf32> to vector<8x256xf32>
    %6 = arith.addf %3, %5 : vector<8x256xf32>
    %cst_5 = arith.constant 0.000000e+00 : f32
    %7 = vector.broadcast %cst_5 : f32 to vector<8x256xf32>
    %8 = arith.maximumf %6, %7 : vector<8x256xf32>
    %9 = arith.truncf %8 : vector<8x256xf32> to vector<8x256xbf16>
    %c0_6 = arith.constant 0 : index
    %c0_7 = arith.constant 0 : index
    %10 = vector.load %arg4[%c0_6, %c0_7] : memref<256x512xbf16, #tpu.memory_space<vmem>>, vector<256x512xbf16>
    %cst_8 = arith.constant dense<0.000000e+00> : vector<8x512xf32>
    %11 = tpu.matmul %9, %10, %cst_8 {dimension_numbers = #tpu.dot_dimension_numbers<[1], [0], [0], [1], [0, 0, 1, 1], [], []>} : vector<8x256xbf16>, vector<256x512xbf16>, vector<8x512xf32> -> vector<8x512xf32>
    %c0_9 = arith.constant 0 : index
    %c0_10 = arith.constant 0 : index
    %12 = vector.load %arg5[%c0_9, %c0_10] : memref<1x512xf32, #tpu.memory_space<vmem>>, vector<1x512xf32>
    %13 = vector.broadcast %12 : vector<1x512xf32> to vector<8x512xf32>
    %14 = arith.addf %11, %13 : vector<8x512xf32>
    %cst_11 = arith.constant 0.000000e+00 : f32
    %15 = vector.broadcast %cst_11 : f32 to vector<8x512xf32>
    %16 = arith.maximumf %14, %15 : vector<8x512xf32>
    %17 = arith.truncf %16 : vector<8x512xf32> to vector<8x512xbf16>
    %c0_12 = arith.constant 0 : index
    %c0_13 = arith.constant 0 : index
    %18 = vector.load %arg6[%c0_12, %c0_13] : memref<512x256xbf16, #tpu.memory_space<vmem>>, vector<512x256xbf16>
    %cst_14 = arith.constant dense<0.000000e+00> : vector<8x256xf32>
    %19 = tpu.matmul %17, %18, %cst_14 {dimension_numbers = #tpu.dot_dimension_numbers<[1], [0], [0], [1], [0, 0, 1, 1], [], []>} : vector<8x512xbf16>, vector<512x256xbf16>, vector<8x256xf32> -> vector<8x256xf32>
    %c0_15 = arith.constant 0 : index
    %c0_16 = arith.constant 0 : index
    %20 = vector.load %arg7[%c0_15, %c0_16] : memref<1x256xf32, #tpu.memory_space<vmem>>, vector<1x256xf32>
    %21 = vector.broadcast %20 : vector<1x256xf32> to vector<8x256xf32>
    %22 = arith.addf %19, %21 : vector<8x256xf32>
    %23 = math.tanh %22 : vector<8x256xf32>
    %c0_17 = arith.constant 0 : index
    %c0_18 = arith.constant 0 : index
    %24 = vector.load %arg8[%c0_17, %c0_18] : memref<8x256xf32, #tpu.memory_space<vmem>>, vector<8x256xf32>
    tpu.vector_store %arg8[%c0_17, %c0_18], %23 {strides = array<i32>} : memref<8x256xf32, #tpu.memory_space<vmem>>, vector<8x256xf32>,
    return
  }
  func.func @transform_0(%arg0: i32) -> (i32, i32) {
    %c0_i32 = arith.constant 0 : i32
    %c0_i32_0 = arith.constant 0 : i32
    return %arg0, %c0_i32 : i32, i32
  }
  func.func @transform_1(%arg0: i32) -> (i32, i32) {
    %c0_i32 = arith.constant 0 : i32
    %c0_i32_0 = arith.constant 0 : i32
    %c0_i32_1 = arith.constant 0 : i32
    return %c0_i32, %c0_i32_0 : i32, i32
  }
  func.func @transform_2(%arg0: i32) -> (i32, i32) {
    %c0_i32 = arith.constant 0 : i32
    %c0_i32_0 = arith.constant 0 : i32
    %c0_i32_1 = arith.constant 0 : i32
    return %c0_i32, %c0_i32_0 : i32, i32
  }
  func.func @transform_3(%arg0: i32) -> (i32, i32) {
    %c0_i32 = arith.constant 0 : i32
    %c0_i32_0 = arith.constant 0 : i32
    %c0_i32_1 = arith.constant 0 : i32
    return %c0_i32, %c0_i32_0 : i32, i32
  }
  func.func @transform_4(%arg0: i32) -> (i32, i32) {
    %c0_i32 = arith.constant 0 : i32
    %c0_i32_0 = arith.constant 0 : i32
    %c0_i32_1 = arith.constant 0 : i32
    return %c0_i32, %c0_i32_0 : i32, i32
  }
  func.func @transform_5(%arg0: i32) -> (i32, i32) {
    %c0_i32 = arith.constant 0 : i32
    %c0_i32_0 = arith.constant 0 : i32
    %c0_i32_1 = arith.constant 0 : i32
    return %c0_i32, %c0_i32_0 : i32, i32
  }
  func.func @transform_6(%arg0: i32) -> (i32, i32) {
    %c0_i32 = arith.constant 0 : i32
    %c0_i32_0 = arith.constant 0 : i32
    %c0_i32_1 = arith.constant 0 : i32
    return %c0_i32, %c0_i32_0 : i32, i32
  }
  func.func @transform_7(%arg0: i32) -> (i32, i32) {
    %c0_i32 = arith.constant 0 : i32
    %c0_i32_0 = arith.constant 0 : i32
    return %arg0, %c0_i32 : i32, i32
  }
}

</mosaic_0001>

<bundles_post_ra>
// kernel: tpu_custom_call.1
= control target key start
LH: loop header
LB: loop body
LE: loop exit
PB: predicated region body
PF: predicated region fallthrough
CT: control target
= control target key end

     0   :  { %12 = vsyncpa [#allocation3], 0  ;;  %s1695_s0 = inlined_call_operand.hbm [shape: f32[8,16], index: 0, kind: input, shape index: {}]   ;;  %s1696_s1 = inlined_call_operand.hbm [shape: bf16[16,256], index: 1, kind: input, shape index: {}]   ;;  %s1697_s2 = inlined_call_operand.vmem [shape: f32[1,256], index: 2, kind: input, shape index: {}]   ;;  %s1698_s3 = inlined_call_operand.hbm [shape: bf16[256,512], index: 3, kind: input, shape index: {}]   ;;  %s1699_s4 = inlined_call_operand.vmem [shape: f32[1,512], index: 4, kind: input, shape index: {}]   ;;  %s1700_s5 = inlined_call_operand.hbm [shape: bf16[512,256], index: 5, kind: input, shape index: {}]   ;;  %s1701_s6 = inlined_call_operand.vmem [shape: f32[1,256], index: 6, kind: input, shape index: {}]   ;;  %s1702_s7 = inlined_call_operand.hbm [shape: f32[8,256], index: 7, kind: output, shape index: {}]  }
   0x1   :  { %13 = vsyncpa [#allocation6], 0 }
   0x2   :  { %14 = vsyncpa [#allocation9], 0 }
   0x3   :  { %15 = vsyncpa [#allocation4], 0  ;;  %s1599_s24 = smov [#allocation5]  }
   0x4   :  { %s31_s25 = sshll.u32 %s1599_s24, 4  ;;  %s32_s25 = int_to_ptr.vmem [resolvable:$true] %s31_s25 }
   0x5   :  { %s1499_s26 = scalar_lea.vmem %s32_s25, 256  ;;  %p1504_p1 = scmp.lt.s32.totalorder %s32_s25, %s32_s25 }
   0x6   :  { %p1500_p0 = scmp.ne.s32.totalorder %s32_s25, %s1499_s26  ;;  %p1505_p2 = scmp.lt.s32.totalorder %s1499_s26, %s1499_s26 }
   0x8   :  { %p1506_p3 = por %p1505_p2, %p1504_p1 }
   0xa   :  { %p1507_p4 = pnand %p1506_p3, %p1500_p0 }
   0xc   :  { %1510 = shalt.err (!%p1507_p4)
}
   0xd   :  { %s1600_s27 = smov 128   ;;  %s1601_s28 = smov 8  }
   0xe   :  { %37 = dma.hbm_to_vmem [thread:$0]  %s1696_s1, 256, %s32_s25, [#allocation6], %s1600_s27, %s1600_s27, %s1601_s28  }
   0xf   :  { %s1602_s8 = smov [#allocation2]   ;;  %s1603_s10 = smov [#allocation7]  }
  0x10   :  { %s22_s9 = sshll.u32 %s1602_s8, 4  ;;  %s45_s11 = sshll.u32 %s1603_s10, 4  ;;  %s23_s9 = int_to_ptr.vmem [resolvable:$true] %s22_s9  ;;  %s46_s11 = int_to_ptr.vmem [resolvable:$true] %s45_s11 }
  0x11   :  { %s1519_s12 = scalar_lea.vmem %s23_s9, 128  ;;  %p1524_p6 = scmp.lt.s32.totalorder %s23_s9, %s23_s9 }
  0x12   :  { %p1520_p5 = scmp.ne.s32.totalorder %s23_s9, %s1519_s12  ;;  %p1525_p7 = scmp.lt.s32.totalorder %s1519_s12, %s1519_s12 }
  0x14   :  { %p1526_p8 = por %p1525_p7, %p1524_p6 }
  0x16   :  { %p1527_p9 = pnand %p1526_p8, %p1520_p5 }
  0x18   :  { %1530 = shalt.err (!%p1527_p9)
}
  0x19   :  { %25 = dma.hbm_to_vmem [thread:$0]  %s1695_s0, 128, %s23_s9, [#allocation3]  }
  0x1a   :  { %s1539_s15 = scalar_lea.vmem %s46_s11, 8192  ;;  %p1544_p11 = scmp.lt.s32.totalorder %s46_s11, %s46_s11 }
  0x1b   :  { %p1540_p10 = scmp.ne.s32.totalorder %s46_s11, %s1539_s15  ;;  %p1545_p12 = scmp.lt.s32.totalorder %s1539_s15, %s1539_s15 }
  0x1d   :  { %p1546_p13 = por %p1545_p12, %p1544_p11 }
  0x1f   :  { %p1547_p0 = pnand %p1546_p13, %p1540_p10 }
  0x21   :  { %1550 = shalt.err (!%p1547_p0)
}
  0x22   :  { %s1604_s1 = smov 256   ;;  %s1605_s16 = smov 16  }
  0x23   :  { %51 = dma.hbm_to_vmem [thread:$0]  %s1698_s3, 8192, %s46_s11, [#allocation6], %s1604_s1, %s1604_s1, %s1605_s16  }
  0x24   :  { %s1606_s19 = smov [#allocation8]  }
  0x25   :  { %s59_s20 = sshll.u32 %s1606_s19, 4  ;;  %s60_s20 = int_to_ptr.vmem [resolvable:$true] %s59_s20 }
  0x26   :  { %s1559_s21 = scalar_lea.vmem %s60_s20, 8192  ;;  %p1564_p2 = scmp.lt.s32.totalorder %s60_s20, %s60_s20 }
  0x27   :  { %p1560_p1 = scmp.ne.s32.totalorder %s60_s20, %s1559_s21  ;;  %p1565_p3 = scmp.lt.s32.totalorder %s1559_s21, %s1559_s21 }
  0x29   :  { %p1566_p4 = por %p1565_p3, %p1564_p2 }
  0x2b   :  { %p1567_p5 = pnand %p1566_p4, %p1560_p1 }
  0x2d   :  { %1570 = shalt.err (!%p1567_p5)
}
  0x2e   :  { %65 = dma.hbm_to_vmem [thread:$0]  %s1700_s5, 8192, %s60_s20, [#allocation9], %s1600_s27, %s1600_s27, %s1601_s28  }
  0x2f   :  { %1591 = dma.done.wait [#allocation3], 128  }
  0x30   :  { %1592 = vsyncadd [#allocation3], 4294967168 }
  0x31   :  { %1593 = dma.done.wait [#allocation6], 8448  }
  0x32   :  { %1594 = vsyncadd [#allocation6], 4294958848 }
  0x33   :  { %1595 = dma.done.wait [#allocation9], 8192  }
  0x34   :  { %1596 = vsyncadd [#allocation9], 4294959104  ;;  %v1607_v0 = vmov 0   ;;  %v1292_v1 = vld [vmem:[#allocation5 + $0x4] ss:$8 sps:$4 sm:$0xff]   ;;  %v81_v3 = vld [vmem:[#allocation2] sm:$0xff] }
  0x35   :  { %143 = vmatprep.mubr.bf16.mxu0 %v1607_v0  ;;  %v1294_v2 = vld [vmem:[#allocation5] ss:$8 sps:$4 sm:$0xff]   ;;  %125 = vmatprep.subr.bf16.mxu0 %v1292_v1  ;;  %v82_v4 = vpack.c.bf16 %v81_v3, %v81_v3  ;;  %v1295_v5 = vld [vmem:[#allocation7 + $0xe4] ss:$16 sps:$4 sm:$0xff]   ;;  %vm107_vm0 = vcmask 130048   ;;  %s1608_s25 = smov [#allocation10]  }
  0x36   :  { %126 = vmatpush1.bf16.msra.mxu0 %v1294_v2  ;;  %v1297_v6 = vld [vmem:[#allocation7 + $0xe8] ss:$16 sps:$4 sm:$0xff]   ;;  %v1299_v7 = vld [vmem:[#allocation7 + $0xec] ss:$16 sps:$4 sm:$0xff]   ;;  %562 = vmatprep.subr.bf16.mxu1 %v1295_v5  ;;  %v1300_v8 = vld [vmem:[#allocation7 + $0xe0] ss:$16 sps:$4 sm:$0xff]  }
  0x37   :  { %603 = vmatprep.subr.bf16.mxu0 %v1299_v7  ;;  %v1301_v9 = vld [vmem:[#allocation7 + $0xc4] ss:$16 sps:$4 sm:$0xff]   ;;  %563 = vmatpush1.bf16.msra.mxu1 %v1300_v8  ;;  %v1303_v10 = vld [vmem:[#allocation7 + $0xc8] ss:$16 sps:$4 sm:$0xff]   ;;  %v1305_v11 = vld [vmem:[#allocation7 + $0xcc] ss:$16 sps:$4 sm:$0xff]   ;;  %v87_v7 = vlaneseq }
  0x38   :  { %v1306_v12 = vld [vmem:[#allocation7 + $0xc0] ss:$16 sps:$4 sm:$0xff]   ;;  %564 = vmatprep.subr.bf16.mxu1 %v1301_v9  ;;  %v1307_v13 = vld [vmem:[#allocation7 + $0xa4] ss:$16 sps:$4 sm:$0xff]   ;;  %v1311_v14 = vld [vmem:[#allocation7 + $0xac] ss:$16 sps:$4 sm:$0xff]  }
  0x39   :  { %1153 = vmatmul.mubr.msk.bf16.vlgmr.msra.gmra.mxu0 %vm107_vm0, %v82_v4  ;;  %v1312_v15 = vld [vmem:[#allocation7 + $0xa0] ss:$16 sps:$4 sm:$0xff]   ;;  %v1309_v16 = vld [vmem:[#allocation7 + $0xa8] ss:$16 sps:$4 sm:$0xff]   ;;  %v1313_v17 = vld [vmem:[#allocation7 + $0x84] ss:$16 sps:$4 sm:$0xff]  }
  0x3a   :  { %604 = vmatpush1.bf16.msra.mxu0 %v1297_v6  ;;  %v1317_v18 = vld [vmem:[#allocation7 + $0x8c] ss:$16 sps:$4 sm:$0xff]   ;;  %v1315_v19 = vld [vmem:[#allocation7 + $0x88] ss:$16 sps:$4 sm:$0xff]   ;;  %v1318_v20 = vld [vmem:[#allocation7 + $0x80] ss:$16 sps:$4 sm:$0xff]  }
  0x3b   :  { %605 = vmatprep.subr.bf16.mxu0 %v1305_v11  ;;  %565 = vmatpush1.bf16.msra.mxu1 %v1306_v12  ;;  %v1319_v21 = vld [vmem:[#allocation7 + $0x64] ss:$16 sps:$4 sm:$0xff]   ;;  %v1323_v22 = vld [vmem:[#allocation7 + $0x6c] ss:$16 sps:$4 sm:$0xff]   ;;  %v1324_v23 = vld [vmem:[#allocation7 + $0x60] ss:$16 sps:$4 sm:$0xff]  }
  0x3c   :  { %566 = vmatprep.subr.bf16.mxu1 %v1307_v13  ;;  %v1321_v24 = vld [vmem:[#allocation7 + $0x68] ss:$16 sps:$4 sm:$0xff]   ;;  %v1325_v25 = vld [vmem:[#allocation7 + $0x44] ss:$16 sps:$4 sm:$0xff]   ;;  %v1329_v26 = vld [vmem:[#allocation7 + $0x4c] ss:$16 sps:$4 sm:$0xff]  }
  0x3d   :  { %v1327_v27 = vld [vmem:[#allocation7 + $0x48] ss:$16 sps:$4 sm:$0xff]   ;;  %v1330_v28 = vld [vmem:[#allocation7 + $0x40] ss:$16 sps:$4 sm:$0xff]   ;;  %v1331_v29 = vld [vmem:[#allocation7 + $0x24] ss:$16 sps:$4 sm:$0xff]  }
  0x3e   :  { %606 = vmatpush1.bf16.msra.mxu0 %v1303_v10  ;;  %v1335_v30 = vld [vmem:[#allocation7 + $0x2c] ss:$16 sps:$4 sm:$0xff]   ;;  %v1336_v31 = vld [vmem:[#allocation7 + $0x20] ss:$16 sps:$4 sm:$0xff]   ;;  %v1333_v32 = vld [vmem:[#allocation7 + $0x28] ss:$16 sps:$4 sm:$0xff]  }
  0x3f   :  { %607 = vmatprep.subr.bf16.mxu0 %v1311_v14  ;;  %567 = vmatpush1.bf16.msra.mxu1 %v1312_v15  ;;  %v1337_v33 = vld [vmem:[#allocation7 + $0x4] ss:$16 sps:$4 sm:$0xff]   ;;  %v1341_v34 = vld [vmem:[#allocation7 + $0xc] ss:$16 sps:$4 sm:$0xff]   ;;  %v1339_v35 = vld [vmem:[#allocation7 + $0x8] ss:$16 sps:$4 sm:$0xff]  }
  0x40   :  { %568 = vmatprep.subr.bf16.mxu1 %v1313_v17  ;;  %v1342_v36 = vld [vmem:[#allocation7] ss:$16 sps:$4 sm:$0xff]   ;;  %v1343_v37 = vld [vmem:[#allocation7 + $0x1e4] ss:$16 sps:$4 sm:$0xff]   ;;  %v1347_v38 = vld [vmem:[#allocation7 + $0x1ec] ss:$16 sps:$4 sm:$0xff]  }
  0x41   :  { %v1348_v39 = vld [vmem:[#allocation7 + $0x1e0] ss:$16 sps:$4 sm:$0xff]   ;;  %v1345_v40 = vld [vmem:[#allocation7 + $0x1e8] ss:$16 sps:$4 sm:$0xff]   ;;  %v1349_v41 = vld [vmem:[#allocation7 + $0x1c4] ss:$16 sps:$4 sm:$0xff]  }
  0x42   :  { %608 = vmatpush1.bf16.msra.mxu0 %v1309_v16  ;;  %v1353_v42 = vld [vmem:[#allocation7 + $0x1cc] ss:$16 sps:$4 sm:$0xff]   ;;  %v1351_v43 = vld [vmem:[#allocation7 + $0x1c8] ss:$16 sps:$4 sm:$0xff]   ;;  %v1354_v44 = vld [vmem:[#allocation7 + $0x1c0] ss:$16 sps:$4 sm:$0xff]  }
  0x43   :  { %609 = vmatprep.subr.bf16.mxu0 %v1317_v18  ;;  %569 = vmatpush1.bf16.msra.mxu1 %v1318_v20  ;;  %v1355_v45 = vld [vmem:[#allocation7 + $0x1a4] ss:$16 sps:$4 sm:$0xff]   ;;  %v1359_v46 = vld [vmem:[#allocation7 + $0x1ac] ss:$16 sps:$4 sm:$0xff]   ;;  %v1360_v47 = vld [vmem:[#allocation7 + $0x1a0] ss:$16 sps:$4 sm:$0xff]  }
  0x44   :  { %570 = vmatprep.subr.bf16.mxu1 %v1319_v21  ;;  %v1357_v48 = vld [vmem:[#allocation7 + $0x1a8] ss:$16 sps:$4 sm:$0xff]   ;;  %v1361_v49 = vld [vmem:[#allocation7 + $0x184] ss:$16 sps:$4 sm:$0xff]   ;;  %v1365_v50 = vld [vmem:[#allocation7 + $0x18c] ss:$16 sps:$4 sm:$0xff]  }
  0x45   :  { %v1366_v51 = vld [vmem:[#allocation7 + $0x180] ss:$16 sps:$4 sm:$0xff]   ;;  %v1363_v52 = vld [vmem:[#allocation7 + $0x188] ss:$16 sps:$4 sm:$0xff]   ;;  %v1367_v53 = vld [vmem:[#allocation7 + $0x164] ss:$16 sps:$4 sm:$0xff]  }
  0x46   :  { %610 = vmatpush1.bf16.msra.mxu0 %v1315_v19  ;;  %v1371_v54 = vld [vmem:[#allocation7 + $0x16c] ss:$16 sps:$4 sm:$0xff]   ;;  %v1372_v55 = vld [vmem:[#allocation7 + $0x160] ss:$16 sps:$4 sm:$0xff]   ;;  %v1369_v56 = vld [vmem:[#allocation7 + $0x168] ss:$16 sps:$4 sm:$0xff]  }
  0x47   :  { %611 = vmatprep.subr.bf16.mxu0 %v1323_v22  ;;  %571 = vmatpush1.bf16.msra.mxu1 %v1324_v23  ;;  %v1373_v57 = vld [vmem:[#allocation7 + $0x144] ss:$16 sps:$4 sm:$0xff]   ;;  %v1377_v58 = vld [vmem:[#allocation7 + $0x14c] ss:$16 sps:$4 sm:$0xff]   ;;  %v1378_v59 = vld [vmem:[#allocation7 + $0x140] ss:$16 sps:$4 sm:$0xff]  }
  0x48   :  { %572 = vmatprep.subr.bf16.mxu1 %v1325_v25  ;;  %v1375_v60 = vld [vmem:[#allocation7 + $0x148] ss:$16 sps:$4 sm:$0xff]   ;;  %v1379_v61 = vld [vmem:[#allocation7 + $0x124] ss:$16 sps:$4 sm:$0xff]   ;;  %v1383_v62 = vld [vmem:[#allocation7 + $0x12c] ss:$16 sps:$4 sm:$0xff]  }
  0x49   :  { %v1381_v63 = vld [vmem:[#allocation7 + $0x128] ss:$16 sps:$4 sm:$0xff]   ;;  %v1384_v0 = vld [vmem:[#allocation7 + $0x120] ss:$16 sps:$4 sm:$0xff]   ;;  %v1385_v1 = vld [vmem:[#allocation7 + $0x104] ss:$16 sps:$4 sm:$0xff]  }
  0x4a   :  { %612 = vmatpush1.bf16.msra.mxu0 %v1321_v24  ;;  %v1389_v2 = vld [vmem:[#allocation7 + $0x10c] ss:$16 sps:$4 sm:$0xff]   ;;  %v1387_v3 = vld [vmem:[#allocation7 + $0x108] ss:$16 sps:$4 sm:$0xff]   ;;  %v1390_v4 = vld [vmem:[#allocation7 + $0x100] ss:$16 sps:$4 sm:$0xff]  }
  0x4b   :  { %613 = vmatprep.subr.bf16.mxu0 %v1329_v26  ;;  %573 = vmatpush1.bf16.msra.mxu1 %v1330_v28  ;;  %v1393_v5 = vld [vmem:[#allocation8 + $0x74] ss:$8 sps:$4 sm:$0xff]   ;;  %v1667_v8 = vshrl.u32 %v87_v7, 7  ;;  %v85_v10 = vld [vmem:[%s1697_s2] sm:$0x3] }
  0x4c   :  { %574 = vmatprep.subr.bf16.mxu1 %v1331_v29  ;;  %v1396_v6 = vld [vmem:[#allocation8 + $0x174] ss:$8 sps:$4 sm:$0xff]   ;;  %v1391_v23 = vld [vmem:[#allocation8 + $0x70] ss:$8 sps:$4 sm:$0xff]   ;;  %v1399_v26 = vld [vmem:[#allocation8 + $0x64] ss:$8 sps:$4 sm:$0xff]  }
  0x4d   :  { %v1670_v9 = vsub.s32 0, %v1667_v8  ;;  %v1676_v11 = vsub.s32 1, %v1667_v8  ;;  %v1394_v24 = vld [vmem:[#allocation8 + $0x170] ss:$8 sps:$4 sm:$0xff]   ;;  %v1397_v28 = vld [vmem:[#allocation8 + $0x60] ss:$8 sps:$4 sm:$0xff]  }
  0x4e   :  { %614 = vmatpush1.bf16.msra.mxu0 %v1327_v27  ;;  %v1402_v27 = vld [vmem:[#allocation8 + $0x164] ss:$8 sps:$4 sm:$0xff]   ;;  %v1400_v29 = vld [vmem:[#allocation8 + $0x160] ss:$8 sps:$4 sm:$0xff]   ;;  %v1468_v7 = vld [vmem:[#allocation8 + $0x1b4] ss:$8 sps:$4 sm:$0xff]  }
  0x4f   :  { %615 = vmatprep.subr.bf16.mxu0 %v1335_v30  ;;  %575 = vmatpush1.bf16.msra.mxu1 %v1336_v31  ;;  %v90_v12 = vrot.slane %v85_v10, %v1670_v9  ;;  %v94_v13 = vrot.slane %v85_v10, %v1676_v11  ;;  %v1405_v30 = vld [vmem:[#allocation8 + $0x54] ss:$8 sps:$4 sm:$0xff]   ;;  %v1463_v10 = vld [vmem:[#allocation8 + $0xb0] ss:$8 sps:$4 sm:$0xff]  }
  0x50   :  { %576 = vmatprep.subr.bf16.mxu1 %v1337_v33  ;;  %v1408_v31 = vld [vmem:[#allocation8 + $0x154] ss:$8 sps:$4 sm:$0xff]   ;;  %v1406_v33 = vld [vmem:[#allocation8 + $0x150] ss:$8 sps:$4 sm:$0xff]  }
  0x52   :  { %616 = vmatpush1.bf16.msra.mxu0 %v1333_v32  ;;  %v1403_v32 = vld [vmem:[#allocation8 + $0x50] ss:$8 sps:$4 sm:$0xff]  }
  0x53   :  { %617 = vmatprep.subr.bf16.mxu0 %v1341_v34  ;;  %577 = vmatpush1.bf16.msra.mxu1 %v1342_v36  ;;  %v1411_v34 = vld [vmem:[#allocation8 + $0x44] ss:$8 sps:$4 sm:$0xff]   ;;  %v1409_v36 = vld [vmem:[#allocation8 + $0x40] ss:$8 sps:$4 sm:$0xff]  }
  0x54   :  { %578 = vmatprep.subr.bf16.mxu1 %v1343_v37  ;;  %v1412_v37 = vld [vmem:[#allocation8 + $0x140] ss:$8 sps:$4 sm:$0xff]  }
  0x56   :  { %618 = vmatpush1.bf16.msra.mxu0 %v1339_v35  ;;  %v1414_v35 = vld [vmem:[#allocation8 + $0x144] ss:$8 sps:$4 sm:$0xff]  }
  0x57   :  { %619 = vmatprep.subr.bf16.mxu0 %v1347_v38  ;;  %579 = vmatpush2.bf16.msra.mxu1 %v1348_v39  ;;  %v1417_v38 = vld [vmem:[#allocation8 + $0x34] ss:$8 sps:$4 sm:$0xff]  }
  0x58   :  { %580 = vmatprep.subr.bf16.mxu1 %v1349_v41  ;;  %v1420_v39 = vld [vmem:[#allocation8 + $0x134] ss:$8 sps:$4 sm:$0xff]   ;;  %v1418_v41 = vld [vmem:[#allocation8 + $0x130] ss:$8 sps:$4 sm:$0xff]  }
  0x5a   :  { %620 = vmatpush2.bf16.msra.mxu0 %v1345_v40  ;;  %v1415_v40 = vld [vmem:[#allocation8 + $0x30] ss:$8 sps:$4 sm:$0xff]  }
  0x5b   :  { %621 = vmatprep.subr.bf16.mxu0 %v1353_v42  ;;  %581 = vmatpush2.bf16.msra.mxu1 %v1354_v44  ;;  %v1423_v42 = vld [vmem:[#allocation8 + $0x24] ss:$8 sps:$4 sm:$0xff]   ;;  %v1421_v44 = vld [vmem:[#allocation8 + $0x20] ss:$8 sps:$4 sm:$0xff]  }
  0x5c   :  { %582 = vmatprep.subr.bf16.mxu1 %v1355_v45  ;;  %v1424_v45 = vld [vmem:[#allocation8 + $0x120] ss:$8 sps:$4 sm:$0xff]  }
  0x5e   :  { %622 = vmatpush2.bf16.msra.mxu0 %v1351_v43  ;;  %v1426_v43 = vld [vmem:[#allocation8 + $0x124] ss:$8 sps:$4 sm:$0xff]  }
  0x5f   :  { %623 = vmatprep.subr.bf16.mxu0 %v1359_v46  ;;  %583 = vmatpush2.bf16.msra.mxu1 %v1360_v47  ;;  %v1429_v46 = vld [vmem:[#allocation8 + $0x14] ss:$8 sps:$4 sm:$0xff]  }
  0x60   :  { %584 = vmatprep.subr.bf16.mxu1 %v1361_v49  ;;  %v1432_v47 = vld [vmem:[#allocation8 + $0x114] ss:$8 sps:$4 sm:$0xff]   ;;  %v1430_v49 = vld [vmem:[#allocation8 + $0x110] ss:$8 sps:$4 sm:$0xff]  }
  0x62   :  { %624 = vmatpush2.bf16.msra.mxu0 %v1357_v48  ;;  %v1427_v48 = vld [vmem:[#allocation8 + $0x10] ss:$8 sps:$4 sm:$0xff]  }
  0x63   :  { %625 = vmatprep.subr.bf16.mxu0 %v1365_v50  ;;  %585 = vmatpush2.bf16.msra.mxu1 %v1366_v51  ;;  %v1435_v50 = vld [vmem:[#allocation8 + $0x4] ss:$8 sps:$4 sm:$0xff]  }
  0x64   :  { %586 = vmatprep.subr.bf16.mxu1 %v1367_v53  ;;  %v1438_v51 = vld [vmem:[#allocation8 + $0x104] ss:$8 sps:$4 sm:$0xff]   ;;  %v1436_v53 = vld [vmem:[#allocation8 + $0x100] ss:$8 sps:$4 sm:$0xff]  }
  0x66   :  { %626 = vmatpush2.bf16.msra.mxu0 %v1363_v52  ;;  %v1433_v52 = vld [vmem:[#allocation8] ss:$8 sps:$4 sm:$0xff]  }
  0x67   :  { %627 = vmatprep.subr.bf16.mxu0 %v1371_v54  ;;  %587 = vmatpush2.bf16.msra.mxu1 %v1372_v55  ;;  %v1441_v54 = vld [vmem:[#allocation8 + $0xf4] ss:$8 sps:$4 sm:$0xff]  }
  0x68   :  { %588 = vmatprep.subr.bf16.mxu1 %v1373_v57  ;;  %v1444_v55 = vld [vmem:[#allocation8 + $0x1f4] ss:$8 sps:$4 sm:$0xff]   ;;  %v1442_v57 = vld [vmem:[#allocation8 + $0x1f0] ss:$8 sps:$4 sm:$0xff]  }
  0x6a   :  { %628 = vmatpush2.bf16.msra.mxu0 %v1369_v56  ;;  %v1439_v56 = vld [vmem:[#allocation8 + $0xf0] ss:$8 sps:$4 sm:$0xff]  }
  0x6b   :  { %629 = vmatprep.subr.bf16.mxu0 %v1377_v58  ;;  %589 = vmatpush2.bf16.msra.mxu1 %v1378_v59  ;;  %v1447_v58 = vld [vmem:[#allocation8 + $0xe4] ss:$8 sps:$4 sm:$0xff]  }
  0x6c   :  { %590 = vmatprep.subr.bf16.mxu1 %v1379_v61  ;;  %v1450_v59 = vld [vmem:[#allocation8 + $0x1e4] ss:$8 sps:$4 sm:$0xff]   ;;  %v1448_v61 = vld [vmem:[#allocation8 + $0x1e0] ss:$8 sps:$4 sm:$0xff]  }
  0x6e   :  { %630 = vmatpush2.bf16.msra.mxu0 %v1375_v60  ;;  %v1445_v60 = vld [vmem:[#allocation8 + $0xe0] ss:$8 sps:$4 sm:$0xff]  }
  0x6f   :  { %631 = vmatprep.subr.bf16.mxu0 %v1383_v62  ;;  %591 = vmatpush2.bf16.msra.mxu1 %v1384_v0  ;;  %v1453_v62 = vld [vmem:[#allocation8 + $0xd4] ss:$8 sps:$4 sm:$0xff]   ;;  %v1451_v0 = vld [vmem:[#allocation8 + $0xd0] ss:$8 sps:$4 sm:$0xff]  }
  0x70   :  { %592 = vmatprep.subr.bf16.mxu1 %v1385_v1  ;;  %v1454_v1 = vld [vmem:[#allocation8 + $0x1d0] ss:$8 sps:$4 sm:$0xff]  }
  0x72   :  { %632 = vmatpush2.bf16.msra.mxu0 %v1381_v63  ;;  %v1456_v63 = vld [vmem:[#allocation8 + $0x1d4] ss:$8 sps:$4 sm:$0xff]  }
  0x73   :  { %633 = vmatprep.subr.bf16.mxu0 %v1389_v2  ;;  %593 = vmatpush2.bf16.msra.mxu1 %v1390_v4  ;;  %v1459_v2 = vld [vmem:[#allocation8 + $0xc4] ss:$8 sps:$4 sm:$0xff]   ;;  %v1457_v4 = vld [vmem:[#allocation8 + $0xc0] ss:$8 sps:$4 sm:$0xff]  }
  0x74   :  { %1048 = vmatprep.subr.bf16.mxu1 %v1393_v5  ;;  %v1460_v5 = vld [vmem:[#allocation8 + $0x1c0] ss:$8 sps:$4 sm:$0xff]  }
  0x76   :  { %634 = vmatpush2.bf16.msra.mxu0 %v1387_v3  ;;  %v1462_v3 = vld [vmem:[#allocation8 + $0x1c4] ss:$8 sps:$4 sm:$0xff]  }
  0x77   :  { %1089 = vmatprep.subr.bf16.mxu0 %v1396_v6  ;;  %v1465_v6 = vld [vmem:[#allocation8 + $0xb4] ss:$8 sps:$4 sm:$0xff]  }
  0xf9   :  { %v145_v14 = vpop.f32.mrf.mxu0 }
  0xfa   :  { %v146_v15 = vadd.f32 %v145_v14, %v90_v12  ;;  %v1466_v12 = vld [vmem:[#allocation8 + $0x1b0] ss:$8 sps:$4 sm:$0xff]   ;;  %v1474_v14 = vld [vmem:[#allocation8 + $0x1a4] ss:$8 sps:$4 sm:$0xff]  }
  0xfb   :  { %v147_v16 = vpop.f32.mrf.mxu0 }
  0xfc   :  { %v148_v17 = vadd.f32 %v147_v16, %v94_v13  ;;  %v152_v18 = vmax.f32 %v146_v15, 0.0  ;;  %v1471_v13 = vld [vmem:[#allocation8 + $0xa4] ss:$8 sps:$4 sm:$0xff]   ;;  %v1469_v15 = vld [vmem:[#allocation8 + $0xa0] ss:$8 sps:$4 sm:$0xff]  }
  0xfd   :  { %v149_v19 = vpop.f32.mrf.mxu0  ;;  %v1472_v16 = vld [vmem:[#allocation8 + $0x1a0] ss:$8 sps:$4 sm:$0xff]  }
  0xfe   :  { %v153_v20 = vmax.f32 %v148_v17, 0.0  ;;  %v154_v25 = vpack.c.bf16 %v152_v18, %v152_v18  ;;  %v1477_v17 = vld [vmem:[#allocation8 + $0x94] ss:$8 sps:$4 sm:$0xff]   ;;  %v1475_v19 = vld [vmem:[#allocation8 + $0x90] ss:$8 sps:$4 sm:$0xff]  }
  0xff   :  { %v150_v21 = vpop.f32.mrf.mxu0  ;;  %v1480_v18 = vld [vmem:[#allocation8 + $0x194] ss:$8 sps:$4 sm:$0xff]  }
 0x100   :  { %v155_v22 = vpack.c.bf16 %v153_v20, %v153_v20  ;;  %v1478_v20 = vld [vmem:[#allocation8 + $0x190] ss:$8 sps:$4 sm:$0xff]   ;;  %v1483_v21 = vld [vmem:[#allocation8 + $0x84] ss:$8 sps:$4 sm:$0xff]  }
 0x102   :  { %594 = vmatprep.mubr.bf16.mxu1 %v155_v22  ;;  %635 = vmatprep.mubr.bf16.mxu0 %v155_v22  ;;  %v1486_v22 = vld [vmem:[#allocation8 + $0x184] ss:$8 sps:$4 sm:$0xff]  }
 0x103   :  { %595 = vmatmul.mubr.bf16.vlgmr.msra.gmra.mxu1 %v154_v25  ;;  %636 = vmatmul.mubr.bf16.vlgmr.msra.gmra.mxu0 %v154_v25  ;;  %v232_v25 = vsub.s32 2, %v1667_v8 }
 0x104   :  { %1049 = vmatpush1.bf16.msra.mxu1 %v1391_v23  ;;  %1090 = vmatpush1.bf16.msra.mxu0 %v1394_v24  ;;  %v1481_v23 = vld [vmem:[#allocation8 + $0x80] ss:$8 sps:$4 sm:$0xff]  }
 0x105   :  { %1050 = vmatprep.subr.bf16.mxu1 %v1399_v26  ;;  %1091 = vmatprep.subr.bf16.mxu0 %v1402_v27  ;;  %v1484_v24 = vld [vmem:[#allocation8 + $0x180] ss:$8 sps:$4 sm:$0xff]   ;;  %v236_v27 = vsub.s32 3, %v1667_v8 }
 0x106   :  { %v220_v26 = vld [vmem:[%s1699_s4] sm:$0xf] }
 0x108   :  { %1051 = vmatpush1.bf16.msra.mxu1 %v1397_v28  ;;  %1092 = vmatpush1.bf16.msra.mxu0 %v1400_v29  ;;  %v225_v28 = vrot.slane %v220_v26, %v1670_v9  ;;  %v233_v29 = vrot.slane %v220_v26, %v232_v25 }
 0x109   :  { %1052 = vmatprep.subr.bf16.mxu1 %v1405_v30  ;;  %1093 = vmatprep.subr.bf16.mxu0 %v1408_v31  ;;  %v229_v30 = vrot.slane %v220_v26, %v1676_v11  ;;  %v237_v31 = vrot.slane %v220_v26, %v236_v27 }
 0x10c   :  { %1053 = vmatpush1.bf16.msra.mxu1 %v1403_v32  ;;  %1094 = vmatpush1.bf16.msra.mxu0 %v1406_v33 }
 0x10d   :  { %1054 = vmatprep.subr.bf16.mxu1 %v1411_v34  ;;  %1095 = vmatprep.subr.bf16.mxu0 %v1414_v35 }
 0x110   :  { %1055 = vmatpush1.bf16.msra.mxu1 %v1409_v36  ;;  %1096 = vmatpush1.bf16.msra.mxu0 %v1412_v37 }
 0x111   :  { %1056 = vmatprep.subr.bf16.mxu1 %v1417_v38  ;;  %1097 = vmatprep.subr.bf16.mxu0 %v1420_v39 }
 0x114   :  { %1057 = vmatpush1.bf16.msra.mxu1 %v1415_v40  ;;  %1098 = vmatpush1.bf16.msra.mxu0 %v1418_v41 }
 0x115   :  { %1058 = vmatprep.subr.bf16.mxu1 %v1423_v42  ;;  %1099 = vmatprep.subr.bf16.mxu0 %v1426_v43 }
 0x118   :  { %1059 = vmatpush1.bf16.msra.mxu1 %v1421_v44  ;;  %1100 = vmatpush1.bf16.msra.mxu0 %v1424_v45 }
 0x119   :  { %1060 = vmatprep.subr.bf16.mxu1 %v1429_v46  ;;  %1101 = vmatprep.subr.bf16.mxu0 %v1432_v47 }
 0x11c   :  { %1061 = vmatpush1.bf16.msra.mxu1 %v1427_v48  ;;  %1102 = vmatpush1.bf16.msra.mxu0 %v1430_v49 }
 0x11d   :  { %1062 = vmatprep.subr.bf16.mxu1 %v1435_v50  ;;  %1103 = vmatprep.subr.bf16.mxu0 %v1438_v51  ;;  %v716_v51 = vld [vmem:[%s1701_s6] sm:$0x3]  ;;  %s1140_s6 = sshll.u32 %s1608_s25, 4  ;;  %s1141_s6 = int_to_ptr.vmem [resolvable:$true] %s1140_s6 }
 0x11e   :  { %s1571_s26 = scalar_lea.vmem %s1141_s6, 256  ;;  %p1576_p7 = scmp.lt.s32.totalorder %s1141_s6, %s1141_s6 }
 0x11f   :  { %p1572_p6 = scmp.ne.s32.totalorder %s1141_s6, %s1571_s26  ;;  %p1577_p8 = scmp.lt.s32.totalorder %s1571_s26, %s1571_s26 }
 0x120   :  { %1063 = vmatpush1.bf16.msra.mxu1 %v1433_v52  ;;  %1104 = vmatpush1.bf16.msra.mxu0 %v1436_v53  ;;  %v721_v52 = vrot.slane %v716_v51, %v1670_v9  ;;  %v725_v53 = vrot.slane %v716_v51, %v1676_v11 }
 0x121   :  { %1064 = vmatprep.subr.bf16.mxu1 %v1441_v54  ;;  %1105 = vmatprep.subr.bf16.mxu0 %v1444_v55  ;;  %p1578_p9 = por %p1577_p8, %p1576_p7 }
 0x123   :  { %p1579_p10 = pnand %p1578_p9, %p1572_p6 }
 0x124   :  { %1065 = vmatpush2.bf16.msra.mxu1 %v1439_v56  ;;  %1106 = vmatpush2.bf16.msra.mxu0 %v1442_v57 }
 0x125   :  { %1066 = vmatprep.subr.bf16.mxu1 %v1447_v58  ;;  %1107 = vmatprep.subr.bf16.mxu0 %v1450_v59 }
 0x128   :  { %1067 = vmatpush2.bf16.msra.mxu1 %v1445_v60  ;;  %1108 = vmatpush2.bf16.msra.mxu0 %v1448_v61 }
 0x129   :  { %1068 = vmatprep.subr.bf16.mxu1 %v1453_v62  ;;  %1109 = vmatprep.subr.bf16.mxu0 %v1456_v63 }
 0x12c   :  { %1069 = vmatpush2.bf16.msra.mxu1 %v1451_v0  ;;  %1110 = vmatpush2.bf16.msra.mxu0 %v1454_v1 }
 0x12d   :  { %1070 = vmatprep.subr.bf16.mxu1 %v1459_v2  ;;  %1111 = vmatprep.subr.bf16.mxu0 %v1462_v3 }
 0x130   :  { %1071 = vmatpush2.bf16.msra.mxu1 %v1457_v4  ;;  %1112 = vmatpush2.bf16.msra.mxu0 %v1460_v5 }
 0x131   :  { %1072 = vmatprep.subr.bf16.mxu1 %v1465_v6  ;;  %1113 = vmatprep.subr.bf16.mxu0 %v1468_v7 }
 0x134   :  { %1073 = vmatpush2.bf16.msra.mxu1 %v1463_v10  ;;  %1114 = vmatpush2.bf16.msra.mxu0 %v1466_v12 }
 0x135   :  { %1074 = vmatprep.subr.bf16.mxu1 %v1471_v13  ;;  %1115 = vmatprep.subr.bf16.mxu0 %v1474_v14 }
 0x138   :  { %1075 = vmatpush2.bf16.msra.mxu1 %v1469_v15  ;;  %1116 = vmatpush2.bf16.msra.mxu0 %v1472_v16 }
 0x139   :  { %1076 = vmatprep.subr.bf16.mxu1 %v1477_v17  ;;  %1117 = vmatprep.subr.bf16.mxu0 %v1480_v18 }
 0x13c   :  { %1077 = vmatpush2.bf16.msra.mxu1 %v1475_v19  ;;  %1118 = vmatpush2.bf16.msra.mxu0 %v1478_v20 }
 0x13d   :  { %1078 = vmatprep.subr.bf16.mxu1 %v1483_v21  ;;  %1119 = vmatprep.subr.bf16.mxu0 %v1486_v22 }
 0x140   :  { %1079 = vmatpush2.bf16.msra.mxu1 %v1481_v23  ;;  %1120 = vmatpush2.bf16.msra.mxu0 %v1484_v24 }
 0x1c3   :  { %v596_v32 = vpop.f32.mrf.mxu1  ;;  %v637_v33 = vpop.f32.mrf.mxu0 }
 0x1c4   :  { %v597_v34 = vadd.f32 %v596_v32, %v225_v28  ;;  %v638_v35 = vadd.f32 %v637_v33, %v233_v29 }
 0x1c5   :  { %v598_v36 = vpop.f32.mrf.mxu1  ;;  %v639_v37 = vpop.f32.mrf.mxu0 }
 0x1c6   :  { %v599_v38 = vadd.f32 %v598_v36, %v229_v30  ;;  %v640_v39 = vadd.f32 %v639_v37, %v237_v31  ;;  %v644_v40 = vmax.f32 %v597_v34, 0.0  ;;  %v646_v41 = vmax.f32 %v638_v35, 0.0 }
 0x1c7   :  { %v600_v42 = vpop.f32.mrf.mxu1  ;;  %v641_v43 = vpop.f32.mrf.mxu0 }
 0x1c8   :  { %v645_v44 = vmax.f32 %v599_v38, 0.0  ;;  %v647_v8 = vmax.f32 %v640_v39, 0.0  ;;  %v648_v49 = vpack.c.bf16 %v644_v40, %v644_v40  ;;  %v650_v50 = vpack.c.bf16 %v646_v41, %v646_v41 }
 0x1c9   :  { %v601_v45 = vpop.f32.mrf.mxu1  ;;  %v642_v46 = vpop.f32.mrf.mxu0 }
 0x1ca   :  { %v649_v47 = vpack.c.bf16 %v645_v44, %v645_v44  ;;  %v651_v48 = vpack.c.bf16 %v647_v8, %v647_v8 }
 0x1cc   :  { %1080 = vmatprep.mubr.bf16.mxu1 %v649_v47  ;;  %1121 = vmatprep.mubr.bf16.mxu0 %v651_v48 }
 0x1cd   :  { %1081 = vmatmul.mubr.bf16.vlgmr.msra.gmra.mxu1 %v648_v49  ;;  %1122 = vmatmul.mubr.bf16.vlgmr.msra.gmra.mxu0 %v650_v50 }
 0x28d   :  { %v1082_v54 = vpop.f32.mrf.mxu1  ;;  %v1123_v55 = vpop.f32.mrf.mxu0 }
 0x28e   :  { %v1083_v56 = vadd.f32 %v1082_v54, %v721_v52 }
 0x28f   :  { %v1084_v57 = vpop.f32.mrf.mxu1  ;;  %v1125_v58 = vpop.f32.mrf.mxu0 }
 0x290   :  { %v1124_v59 = vadd.f32 %v1123_v55, %v1083_v56  ;;  %v1085_v60 = vadd.f32 %v1084_v57, %v725_v53 }
 0x291   :  { %v1086_v61 = vpop.f32.mrf.mxu1  ;;  %v1127_v62 = vpop.f32.mrf.mxu0 }
 0x292   :  { %1487 = vtanh.f32 %v1124_v59  ;;  %v1126_v63 = vadd.f32 %v1125_v58, %v1085_v60 }
 0x293   :  { %v1087_v0 = vpop.f32.mrf.mxu1  ;;  %v1128_v1 = vpop.f32.mrf.mxu0 }
 0x294   :  { %1489 = vtanh.f32 %v1126_v63 }
 0x29f   :  { %v1488_v2 = vpop.eup %1487 }
 0x2a0   :  { %1132 = vst [vmem:[#allocation10] sm:$0xff] %v1488_v2 }
 0x2a1   :  { %v1490_v9 = vpop.eup %1489 }
 0x2a2   :  { %1133 = vst [vmem:[#allocation10 + $0x8] sm:$0xff] %v1490_v9 }
 0x2a3   :  { %1582 = shalt.err (!%p1579_p10)
}
 0x2a4   :  { %1143 = dma.vmem_to_hbm [thread:$0]  %s1141_s6, 256, %s1702_s7, [#allocation4]  }
 0x2a5   :  { %1597 = dma.done.wait [#allocation4], 256  }
 0x2a6   :  { %1598 = vsyncadd [#allocation4], 4294967040 }
 0x2a7   :  { %1147 = vsyncpa [#allocation3], 1 }
 0x2a8   :  { %1148 = vsyncpa [#allocation6], 1 }
 0x2a9   :  { %1149 = vsyncpa [#allocation9], 1 }
 0x2aa   :  { %1150 = vsyncpa [#allocation4], 1 }

</bundles_post_ra>
